<compile_context>
chip_gen: v6e
topology: v6e:2x2x1
jax: 0.10.0
libtpu: 0.0.40
codegen_flags: <defaults>
</compile_context>

<pallas_src>
import functools
import math

import jax
import jax.numpy as jnp
from jax import lax
from jax.experimental import pallas as pl
from jax.experimental.pallas import tpu as pltpu


# ---------------------------------------------------------------------------
# one-time probe: pltpu.roll shift convention (matches jnp.roll -> +1, else -1)
# ---------------------------------------------------------------------------
@functools.lru_cache(maxsize=1)
def _pltpu_roll_sign() -> int:
    """+1 if pltpu.roll follows jnp.roll's convention on this backend, else -1."""
    def probe(x_ref, o_ref):
        o_ref[...] = pltpu.roll(x_ref[...], 1, 0)

    x = jnp.broadcast_to(jnp.arange(8, dtype=jnp.float32)[:, None], (8, 128))
    y = pl.pallas_call(probe, out_shape=jax.ShapeDtypeStruct((8, 128), jnp.float32))(x)
    # jnp.roll(x, 1, 0)[1, 0] == x[0, 0] == 0.0
    return 1 if float(y[1, 0]) == 0.0 else -1


# ---------------------------------------------------------------------------
# kernel
# ---------------------------------------------------------------------------
def _caresblock_kernel(x_ref, w1_ref, b1_ref, w2_ref, b2_ref, band_ref, o_ref,
                       *, H, W, roll_sign, matmul_dtype):
    # x_ref:  (Bt, H*W, C)  channel-last, images stacked on the sublane axis
    # w*_ref: (9*C, C)      tap-major im2col weights (row = tap*C + cin)
    # b*_ref: (1, C); band_ref: (C, C) banded ECA conv1d matrix
    # o_ref:  (Bt, C, H*W)  channel-major (lane-dense) output
    Bt, HW, C = x_ref.shape
    M = Bt * HW

    x3 = x_ref[...].astype(jnp.float32)            # (Bt, HW, C)
    xf = x3.reshape(M, C)                          # (M, C)

    # per-image flattened spatial coordinates of every row (shared by both convs)
    pos = jax.lax.broadcasted_iota(jnp.int32, (M, 1), 0)
    hh = (pos % HW) // W
    ww = pos % W

    def roll_rows(a, s):
        # result[p, :] = a[(p + s) % M, :]; wrap-around rows are masked by callers.
        return pltpu.roll(a, (roll_sign * (-s)) % M, 0)

    def im2col(a):
        # (M, C) -> (M, 9*C); column block t = ky*3 + kx holds `a` shifted by
        # (dy, dx) = (ky-1, kx-1) with conv zero padding, so one matmul against
        # the (9C, C) weight slab realizes the whole 3x3 convolution.
        cols_w = []
        for dx in (-1, 0, 1):
            if dx == 0:
                cols_w.append(a)
            else:
                ok = (ww + dx >= 0) & (ww + dx < W)
                cols_w.append(jnp.where(ok, roll_rows(a, dx), 0.0))
        base = jnp.concatenate(cols_w, axis=-1)    # (M, 3C): [dx=-1 | dx=0 | dx=+1]

        rows_h = []
        for dy in (-1, 0, 1):
            if dy == 0:
                rows_h.append(base)
            else:
                # dy shift is a whole number of rows (multiple of W -> aligned roll)
                ok = (hh + dy >= 0) & (hh + dy < H)
                rows_h.append(jnp.where(ok, roll_rows(base, dy * W), 0.0))
        return jnp.concatenate(rows_h, axis=-1)    # (M, 9C), tap-major columns

    def conv3x3(a, w_ref, b_ref):
        patch = im2col(a).astype(matmul_dtype)
        y = jnp.dot(patch, w_ref[...], preferred_element_type=jnp.float32)
        return y + b_ref[...]

    y1 = conv3x3(jnp.maximum(xf, 0.0), w1_ref, b1_ref)
    y2 = conv3x3(jnp.maximum(y1, 0.0), w2_ref, b2_ref)
    y2 = y2.reshape(Bt, HW, C)

    # ECA channel attention + residual; store channel-major so the HW axis
    # (multiple of 128 lanes) gets unmasked stores and the wrapper's reshape to
    # NCHW is free (no post-kernel transpose).
    for i in range(Bt):                            # static unroll, Bt is small
        y2_i = y2[i]                                               # (HW, C)
        pooled = jnp.mean(y2_i, axis=0, keepdims=True)             # (1, C)
        att = jax.nn.sigmoid(
            jnp.dot(pooled, band_ref[...],
                    preferred_element_type=jnp.float32))           # (1, C)
        out_i = y2_i * att + x3[i]
        o_ref[i] = jnp.transpose(out_i, (1, 0)).astype(o_ref.dtype)


# ---------------------------------------------------------------------------
# wrapper
# ---------------------------------------------------------------------------
def _pick_batch_tile(B: int, HW: int, C: int, im2col_budget_bytes: int = 8 << 20) -> int:
    """Images per grid step: amortize per-step pipeline overhead, bound the
    in-kernel im2col footprint, and keep >= 2 grid steps when possible so both
    v7x TensorCores get work (v5e/v6e have a single TC and don't care)."""
    per_image = HW * 9 * C * 4                     # f32 im2col bytes per image
    cap = int(max(1, min(8, im2col_budget_bytes // max(per_image, 1))))
    divisors = [d for d in range(1, B + 1) if B % d == 0 and d <= cap]
    multi_step = [d for d in divisors if B // d >= 2]
    return max(multi_step) if multi_step else max(divisors)


def caresblock_pallas(x_flat, w1_2d, b1, w2_2d, b2, band, h, w,
                      *, matmul_dtype=jnp.float32):
    """x_flat: (B, H*W, C) channel-last. Returns (B, C, H*W) channel-major."""
    B, HW, C = x_flat.shape
    assert HW == h * w
    Bt = _pick_batch_tile(B, HW, C)
    grid = (B // Bt,)

    kernel = functools.partial(
        _caresblock_kernel, H=h, W=w,
        roll_sign=_pltpu_roll_sign(), matmul_dtype=matmul_dtype)

    b1_2d = b1.reshape(1, C).astype(jnp.float32)
    b2_2d = b2.reshape(1, C).astype(jnp.float32)
    # NOTE: for production dims (>=128) pass matmul_dtype=jnp.bfloat16 for ~2x
    # MXU throughput; at dim=32 the kernel is overhead-bound so f32 is kept.
    w1c = w1_2d.astype(matmul_dtype)
    w2c = w2_2d.astype(matmul_dtype)
    band_f = band.astype(jnp.float32)

    cost = pl.CostEstimate(
        flops=2 * (2 * B * HW * 9 * C * C) + 2 * B * C * C,
        transcendentals=B * C,
        bytes_accessed=4 * (2 * B * HW * C + 2 * 9 * C * C + C * C + 2 * C),
    )

    return pl.pallas_call(
        kernel,
        out_shape=jax.ShapeDtypeStruct((B, C, HW), x_flat.dtype),
        grid=grid,
        in_specs=[
            pl.BlockSpec((Bt, HW, C), lambda b: (b, 0, 0)),     # x (channel-last)
            pl.BlockSpec((9 * C, C), lambda b: (0, 0)),         # conv1 weights
            pl.BlockSpec((1, C), lambda b: (0, 0)),             # conv1 bias
            pl.BlockSpec((9 * C, C), lambda b: (0, 0)),         # conv2 weights
            pl.BlockSpec((1, C), lambda b: (0, 0)),             # conv2 bias
            pl.BlockSpec((C, C), lambda b: (0, 0)),             # ECA band matrix
        ],
        out_specs=pl.BlockSpec((Bt, C, HW), lambda b: (b, 0, 0)),
        compiler_params=pltpu.CompilerParams(
            dimension_semantics=("parallel",),
            vmem_limit_bytes=32 * 1024 * 1024,
        ),
        cost_estimate=cost,
    )(x_flat, w1c, b1_2d, w2c, b2_2d, band_f)


# ---------------------------------------------------------------------------
# parameter helpers (match the PyTorch module)
# ---------------------------------------------------------------------------
def eca_kernel_size(dim: int) -> int:
    t = int((abs(math.log2(dim)) + 1) // 2)
    return t if t % 2 else t + 1


def build_band_matrix(eca_w: jnp.ndarray, channels: int) -> jnp.ndarray:
    # out[co] = sum_j in[co + j - pad] * eca_w[j]  (zero padded), as pooled @ M
    k = eca_w.shape[0]
    pad = (k - 1) // 2
    ci = jnp.arange(channels)[:, None]
    co = jnp.arange(channels)[None, :]
    j = ci - co + pad
    valid = (j >= 0) & (j < k)
    return jnp.where(valid, eca_w[jnp.clip(j, 0, k - 1)], 0.0).astype(jnp.float32)


def init_params(dim: int, key):
    k1, k2, k3, k4, k5 = jax.random.split(key, 5)
    w1 = jax.random.normal(k1, (dim, dim, 3, 3), jnp.float32) * 0.1   # OIHW (torch)
    b1 = jax.random.normal(k2, (dim,), jnp.float32) * 0.1
    w2 = jax.random.normal(k3, (dim, dim, 3, 3), jnp.float32) * 0.1   # OIHW (torch)
    b2 = jax.random.normal(k4, (dim,), jnp.float32) * 0.1
    eca = jax.random.normal(k5, (eca_kernel_size(dim),), jnp.float32) * 0.5
    return w1, b1, w2, b2, eca


def oihw_to_2d(w_oihw: jnp.ndarray) -> jnp.ndarray:
    # (O, I, 3, 3) -> (ky, kx, I, O) -> (9*I, O); row index = (ky*3 + kx)*I + i
    o, i = w_oihw.shape[0], w_oihw.shape[1]
    return jnp.transpose(w_oihw, (2, 3, 1, 0)).reshape(9 * i, o)


# ---------------------------------------------------------------------------
# PixelFFN forward + pure-JAX reference
# ---------------------------------------------------------------------------
def pixel_ffn_forward(pixel, pixel_flat, params):
    """pixel: (bs, num_objects, dim, h, w); pixel_flat: (bs*num_objects, h*w, dim)."""
    w1, b1, w2, b2, eca = params
    bs, num_objects, dim, h, w = pixel.shape
    band = build_band_matrix(eca, dim)
    y = caresblock_pallas(pixel_flat, oihw_to_2d(w1), b1, oihw_to_2d(w2), b2,
                          band, h, w)
    # kernel emits channel-major (B, C, H*W): pure reshape to NCHW, no transpose
    return y.reshape(bs, num_objects, dim, h, w)


def pixel_ffn_reference(pixel, pixel_flat, params):
    """Pure-JAX reference (mirrors the PyTorch forward)."""
    w1, b1, w2, b2, eca = params
    bs, num_objects, dim, h, w = pixel.shape
    x = pixel_flat.reshape(bs * num_objects, h, w, dim)              # NHWC

    def conv(inp, w_oihw, b):
        w_hwio = jnp.transpose(w_oihw, (2, 3, 1, 0))
        return lax.conv_general_dilated(
            inp, w_hwio, (1, 1), "SAME",
            dimension_numbers=("NHWC", "HWIO", "NHWC")) + b

    r = x
    y = conv(jax.nn.relu(x), w1, b1)
    y = conv(jax.nn.relu(y), w2, b2)
    pooled = jnp.mean(y, axis=(1, 2))                                 # (B, C)
    k = eca.shape[0]
    pad = (k - 1) // 2
    pp = jnp.pad(pooled, ((0, 0), (pad, pad)))
    att = sum(pp[:, j:j + dim] * eca[j] for j in range(k))
    att = jax.nn.sigmoid(att)
    out = y * att[:, None, None, :] + r
    return jnp.transpose(out, (0, 3, 1, 2)).reshape(bs, num_objects, dim, h, w)


if __name__ == "__main__":
    bs, num_objects, dim, h, w = 2, 2, 32, 16, 16

    key = jax.random.PRNGKey(0)
    kp, kx, kf = jax.random.split(key, 3)
    params = init_params(dim, kp)

    pixel = jax.random.normal(kx, (bs, num_objects, dim, h, w), jnp.float32)
    pixel_flat = jax.random.normal(kf, (bs * num_objects, h * w, dim), jnp.float32)

    out = jax.block_until_ready(pixel_ffn_forward(pixel, pixel_flat, params))
    assert out.shape == (bs, num_objects, dim, h, w), out.shape

    ref = jax.block_until_ready(pixel_ffn_reference(pixel, pixel_flat, params))
    max_err = float(jnp.max(jnp.abs(out - ref)))
    # Tolerance is bounded by the XLA reference's default (bf16-operand) conv
    # precision on the MXU, not by the kernel's layout/accumulation.
    assert max_err < 5e-2, f"mismatch vs reference: max abs err {max_err}"

    print("KERNEL_OK")
</pallas_src>

<mosaic_0001>
module attributes {stable_mosaic.version = 11 : i64} {
  func.func @probe(%arg0: memref<8x128xf32, #tpu.memory_space<vmem>>, %arg1: memref<8x128xf32, #tpu.memory_space<vmem>>) attributes {dimension_semantics = [], scalar_prefetch = 0 : i64, scratch_operands = 0 : i64, tpu.core_type = #tpu.core_type<tc>} {
    %c0 = arith.constant 0 : index
    %c0_0 = arith.constant 0 : index
    %0 = vector.load %arg0[%c0, %c0_0] : memref<8x128xf32, #tpu.memory_space<vmem>>, vector<8x128xf32>
    %c1_i32 = arith.constant 1 : i32
    %1 = tpu.dynamic_rotate %0 by %c1_i32 dim 0 : vector<8x128xf32>, i32 -> vector<8x128xf32>
    %c0_1 = arith.constant 0 : index
    %c0_2 = arith.constant 0 : index
    %2 = vector.load %arg1[%c0_1, %c0_2] : memref<8x128xf32, #tpu.memory_space<vmem>>, vector<8x128xf32>
    tpu.vector_store %arg1[%c0_1, %c0_2], %1 {strides = array<i32>} : memref<8x128xf32, #tpu.memory_space<vmem>>, vector<8x128xf32>,
    return
  }
}

</mosaic_0001>

<bundles_post_ra>
// kernel: tpu_custom_call.1
= control target key start
LH: loop header
LB: loop body
LE: loop exit
PB: predicated region body
PF: predicated region fallthrough
CT: control target
= control target key end

     0   :  { %6 = vsyncpa [#allocation3], 0  ;;  %s103_s0 = inlined_call_operand.hbm [shape: f32[8,128], index: 0, kind: input, shape index: {}]   ;;  %s104_s1 = inlined_call_operand.hbm [shape: f32[8,128], index: 1, kind: output, shape index: {}]  }
   0x1   :  { %7 = vsyncpa [#allocation4], 0  ;;  %s85_s6 = smov [#allocation2]  }
   0x2   :  { %s14_s7 = sshll.u32 %s85_s6, 4  ;;  %s15_s7 = int_to_ptr.vmem [resolvable:$true] %s14_s7 }
   0x3   :  { %s49_s8 = scalar_lea.vmem %s15_s7, 128  ;;  %p54_p1 = scmp.lt.s32.totalorder %s15_s7, %s15_s7 }
   0x4   :  { %p50_p0 = scmp.ne.s32.totalorder %s15_s7, %s49_s8  ;;  %p55_p2 = scmp.lt.s32.totalorder %s49_s8, %s49_s8 }
   0x6   :  { %p56_p3 = por %p55_p2, %p54_p1 }
   0x8   :  { %p57_p4 = pnand %p56_p3, %p50_p0 }
   0xa   :  { %60 = shalt.err (!%p57_p4)
}
   0xb   :  { %17 = dma.hbm_to_vmem [thread:$0]  %s103_s0, 128, %s15_s7, [#allocation3]  }
   0xc   :  { %81 = dma.done.wait [#allocation3], 128  }
   0xd   :  { %82 = vsyncadd [#allocation3], 4294967168  ;;  %s86_s11 = smov [#allocation5]   ;;  %v21_v0 = vld [vmem:[#allocation2] sm:$0xff] }
   0xe   :  { %s30_s12 = sshll.u32 %s86_s11, 4  ;;  %v22_v1 = vrot.slane %v21_v0, 7  ;;  %s31_s12 = int_to_ptr.vmem [resolvable:$true] %s30_s12 }
   0xf   :  { %s61_s13 = scalar_lea.vmem %s31_s12, 128  ;;  %p66_p6 = scmp.lt.s32.totalorder %s31_s12, %s31_s12 }
  0x10   :  { %23 = vst [vmem:[#allocation5] sm:$0xff] %v22_v1  ;;  %p62_p5 = scmp.ne.s32.totalorder %s31_s12, %s61_s13  ;;  %p67_p7 = scmp.lt.s32.totalorder %s61_s13, %s61_s13 }
  0x12   :  { %p68_p8 = por %p67_p7, %p66_p6 }
  0x14   :  { %p69_p9 = pnand %p68_p8, %p62_p5 }
  0x16   :  { %72 = shalt.err (!%p69_p9)
}
  0x17   :  { %33 = dma.vmem_to_hbm [thread:$0]  %s31_s12, 128, %s104_s1, [#allocation4]  }
  0x18   :  { %83 = dma.done.wait [#allocation4], 128  }
  0x19   :  { %84 = vsyncadd [#allocation4], 4294967168 }
  0x1a   :  { %37 = vsyncpa [#allocation3], 1 }
  0x1b   :  { %38 = vsyncpa [#allocation4], 1 }

</bundles_post_ra>
